<compile_context>
chip_gen: v6e
topology: v6e:2x2x1
jax: 0.10.0
libtpu: 0.0.40
codegen_flags: <defaults>
</compile_context>

<pallas_src>
import functools

import numpy as np
import jax
import jax.numpy as jnp
from jax.experimental import pallas as pl
from jax.experimental.pallas import tpu as pltpu


def _disc_kernel(h_ref, w_ref, c_ref, b_ref, out_ref):
    """One batch tile per grid step; all negative-sampling rounds in-body.

    h_ref : [TM, n_h]      VMEM  (this tile's h_pl rows)
    w_ref : [n_h, n_h]     VMEM  (bilinear weight, round/tile invariant)
    c_ref : [R1, TM, n_h]  VMEM  (per-round permuted c rows for this tile)
    b_ref : [1, 1]         SMEM  (bilinear bias scalar)
    out   : [R1, TM]       VMEM  (lane-dense scores)
    """
    # Round-invariant MXU work: computed exactly once per batch tile.
    t = jnp.dot(h_ref[...], w_ref[...], preferred_element_type=jnp.float32)  # [TM, n_h]
    # Bilinear score per (round, row): VPU multiply + XLU lane reduction.
    s = jnp.sum(c_ref[...].astype(jnp.float32) * t[None, :, :], axis=-1)     # [R1, TM]
    out_ref[...] = (s + b_ref[0, 0]).astype(out_ref.dtype)


def _perm_indices(batch: int, negsamp_round: int) -> np.ndarray:
    """Composes the `cat((c_mi[-2:-1], c_mi[:-1]), 0)` row re-indexing R times.

    Note: assumes batch >= 2 (the PyTorch module's re-indexing is degenerate
    for batch == 1 anyway).
    """
    idx = list(range(batch))
    rounds = [list(idx)]
    for _ in range(negsamp_round):
        idx = [idx[-2]] + idx[:-1]
        rounds.append(list(idx))
    return np.asarray(rounds, dtype=np.int32)            # [R+1, B]


def _pick_batch_tile(batch: int) -> int:
    """Largest lane-aligned tile dividing B, capped for cross-generation VMEM."""
    for tm in (512, 256, 128):
        if batch % tm == 0:
            return tm
    return batch                                          # single full-extent tile


@functools.partial(jax.jit, static_argnames=("negsamp_round",))
def discriminator_forward(c, h_pl, weight, bias, *, negsamp_round):
    """Fused Discriminator forward. Returns logits of shape [(R+1)*B, 1]."""
    B, n_h = c.shape
    R1 = negsamp_round + 1
    TM = _pick_batch_tile(B)

    # Static row permutations for every round (pure index bookkeeping on host).
    idx = _perm_indices(B, negsamp_round)                 # [R1, B]  (numpy, static)
    c_all = jnp.take(c, jnp.asarray(idx.reshape(-1)), axis=0).reshape(R1, B, n_h)

    w0 = weight[0]                                        # nn.Bilinear weight [n_h, n_h]
    b = jnp.asarray(bias, jnp.float32).reshape(1, 1)      # scalar -> SMEM

    out = pl.pallas_call(
        _disc_kernel,
        out_shape=jax.ShapeDtypeStruct((R1, B), jnp.float32),
        grid=(B // TM,),
        in_specs=[
            pl.BlockSpec((TM, n_h), lambda m: (m, 0)),             # h_pl batch tile
            pl.BlockSpec((n_h, n_h), lambda m: (0, 0)),            # bilinear weight
            pl.BlockSpec((R1, TM, n_h), lambda m: (0, m, 0)),      # per-round c rows
            pl.BlockSpec(memory_space=pltpu.MemorySpace.SMEM),     # bias scalar
        ],
        out_specs=pl.BlockSpec((R1, TM), lambda m: (0, m)),        # lane-dense scores
        compiler_params=pltpu.CompilerParams(
            dimension_semantics=("parallel",),
        ),
    )(h_pl, w0, c_all, b)

    # cat(scs, dim=0) == row-major flatten of the [R1, B] per-round scores.
    return out.reshape(R1 * B, 1)


def reference_forward(c, h_pl, weight, bias, negsamp_round):
    """Plain-JAX reference mirroring the PyTorch forward literally."""
    w0 = weight[0]

    def f_k(x1, x2):
        return jnp.sum((x1 @ w0) * x2, axis=-1, keepdims=True) + bias.reshape(1, 1)

    scs = [f_k(h_pl, c)]
    c_mi = c
    for _ in range(negsamp_round):
        c_mi = jnp.concatenate([c_mi[-2:-1, :], c_mi[:-1, :]], axis=0)
        scs.append(f_k(h_pl, c_mi))
    return jnp.concatenate(scs, axis=0)


if __name__ == "__main__":
    n_h, batch, negsamp_round = 64, 8, 2

    key = jax.random.PRNGKey(0)
    kc, kh, kw = jax.random.split(key, 3)

    c = jax.random.normal(kc, (batch, n_h), jnp.float32)
    h_pl = jax.random.normal(kh, (batch, n_h), jnp.float32)

    # nn.Bilinear(n_h, n_h, 1): weight [1, n_h, n_h] (xavier-uniform), bias = 0.
    fan_in, fan_out = n_h * n_h, 1 * n_h
    bound = float(np.sqrt(6.0 / (fan_in + fan_out)))
    weight = jax.random.uniform(kw, (1, n_h, n_h), jnp.float32, -bound, bound)
    bias = jnp.zeros((1,), jnp.float32)

    logits = discriminator_forward(c, h_pl, weight, bias, negsamp_round=negsamp_round)
    jax.block_until_ready(logits)

    ref = reference_forward(c, h_pl, weight, bias, negsamp_round)
    assert logits.shape == ((negsamp_round + 1) * batch, 1)
    assert jnp.allclose(logits, ref, atol=1e-4, rtol=1e-4)

    print("KERNEL_OK")
</pallas_src>

<mosaic_0001>
module attributes {stable_mosaic.version = 11 : i64} {
  func.func @_disc_kernel(%arg0: i32, %arg1: memref<8x64xf32, #tpu.memory_space<vmem>>, %arg2: memref<64x64xf32, #tpu.memory_space<vmem>>, %arg3: memref<3x8x64xf32, #tpu.memory_space<vmem>>, %arg4: memref<1x1xf32, #tpu.memory_space<smem>>, %arg5: memref<3x8xf32, #tpu.memory_space<vmem>>) attributes {dimension_semantics = [#tpu.dimension_semantics<parallel>], iteration_bounds = array<i64: 1>, scalar_prefetch = 0 : i64, scratch_operands = 0 : i64, tpu.core_type = #tpu.core_type<tc>, window_params = [{transform_indices = @transform_0, window_bounds = array<i64: 8, 64>}, {pipeline_mode = #tpu.pipeline_mode<synchronous>, transform_indices = @transform_1, window_bounds = array<i64: 64, 64>}, {transform_indices = @transform_2, window_bounds = array<i64: 3, 8, 64>}, {transform_indices = @transform_3, window_bounds = array<i64: 1, 1>}, {transform_indices = @transform_4, window_bounds = array<i64: 3, 8>}]} {
    %c0 = arith.constant 0 : index
    %c0_0 = arith.constant 0 : index
    %0 = vector.load %arg1[%c0, %c0_0] : memref<8x64xf32, #tpu.memory_space<vmem>>, vector<8x64xf32>
    %c0_1 = arith.constant 0 : index
    %c0_2 = arith.constant 0 : index
    %1 = vector.load %arg2[%c0_1, %c0_2] : memref<64x64xf32, #tpu.memory_space<vmem>>, vector<64x64xf32>
    %cst = arith.constant dense<0.000000e+00> : vector<8x64xf32>
    %2 = tpu.matmul %0, %1, %cst {dimension_numbers = #tpu.dot_dimension_numbers<[1], [0], [0], [1], [0, 0, 1, 1], [], []>} : vector<8x64xf32>, vector<64x64xf32>, vector<8x64xf32> -> vector<8x64xf32>
    %c0_3 = arith.constant 0 : index
    %c0_4 = arith.constant 0 : index
    %c0_5 = arith.constant 0 : index
    %3 = vector.load %arg3[%c0_3, %c0_4, %c0_5] : memref<3x8x64xf32, #tpu.memory_space<vmem>>, vector<3x8x64xf32>
    %4 = vector.shape_cast %2 : vector<8x64xf32> to vector<1x8x64xf32>
    %5 = vector.broadcast %4 : vector<1x8x64xf32> to vector<3x8x64xf32>
    %6 = arith.mulf %3, %5 : vector<3x8x64xf32>
    %cst_6 = arith.constant dense<0.000000e+00> : vector<3x8xf32>
    %7 = vector.multi_reduction <add>, %6, %cst_6 [2] : vector<3x8x64xf32> to vector<3x8xf32>
    %c0_7 = arith.constant 0 : index
    %c0_8 = arith.constant 0 : index
    %8 = memref.load %arg4[%c0_7, %c0_8] : memref<1x1xf32, #tpu.memory_space<smem>>
    %9 = vector.broadcast %8 : f32 to vector<3x8xf32>
    %10 = arith.addf %7, %9 : vector<3x8xf32>
    %c0_9 = arith.constant 0 : index
    %c0_10 = arith.constant 0 : index
    %11 = vector.load %arg5[%c0_9, %c0_10] : memref<3x8xf32, #tpu.memory_space<vmem>>, vector<3x8xf32>
    tpu.vector_store %arg5[%c0_9, %c0_10], %10 {strides = array<i32>} : memref<3x8xf32, #tpu.memory_space<vmem>>, vector<3x8xf32>,
    return
  }
  func.func @transform_0(%arg0: i32) -> (i32, i32) {
    %c0_i32 = arith.constant 0 : i32
    %c0_i32_0 = arith.constant 0 : i32
    return %arg0, %c0_i32 : i32, i32
  }
  func.func @transform_1(%arg0: i32) -> (i32, i32) {
    %c0_i32 = arith.constant 0 : i32
    %c0_i32_0 = arith.constant 0 : i32
    %c0_i32_1 = arith.constant 0 : i32
    return %c0_i32, %c0_i32_0 : i32, i32
  }
  func.func @transform_2(%arg0: i32) -> (i32, i32, i32) {
    %c0_i32 = arith.constant 0 : i32
    %c0_i32_0 = arith.constant 0 : i32
    %c0_i32_1 = arith.constant 0 : i32
    return %c0_i32, %arg0, %c0_i32_0 : i32, i32, i32
  }
  func.func @transform_3(%arg0: i32) -> (i32, i32) {
    %c0_i32 = arith.constant 0 : i32
    %c0_i32_0 = arith.constant 0 : i32
    %c0_i32_1 = arith.constant 0 : i32
    return %c0_i32, %c0_i32_0 : i32, i32
  }
  func.func @transform_4(%arg0: i32) -> (i32, i32) {
    %c0_i32 = arith.constant 0 : i32
    %c0_i32_0 = arith.constant 0 : i32
    return %c0_i32, %arg0 : i32, i32
  }
}

</mosaic_0001>

<bundles_post_ra>
// kernel: discriminator_forward.1
= control target key start
LH: loop header
LB: loop body
LE: loop exit
PB: predicated region body
PF: predicated region fallthrough
CT: control target
= control target key end

     0   :  { %v180_v0 = vmov 0.0   ;;  %vm181_vm0 = vmmov 0   ;;  %vm27_vm1 = vcmask 523264   ;;  %v124_v21 = vlaneseq  ;;  %s253_s1 = inlined_call_operand.vmem [shape: f32[64,64], index: 1, kind: input, shape index: {}]   ;;  %s254_s0 = inlined_call_operand.vmem [shape: f32[8,64], index: 0, kind: input, shape index: {}]   ;;  %s255_s2 = inlined_call_operand.vmem [shape: f32[3,8,64], index: 2, kind: input, shape index: {}]   ;;  %s256_s3 = inlined_call_operand.<no memory space> [shape: f32[1,1], index: 3, kind: input, shape index: {}]   ;;  %s257_s4 = inlined_call_operand.vmem [shape: f32[3,8], index: 4, kind: output, shape index: {}]  }
   0x1   :  { %159 = vmatprep.subr.mxu0 %v180_v0  ;;  %v26_v1 = vld [vmem:[%s253_s1 + $0x38] sm:$0xff]  ;;  %v25_v2 = vld [vmem:[%s253_s1 + $0x30] sm:$0xff]  ;;  %175 = vmatprep.mubr.msk.f32.mxu0 %vm181_vm0, %v180_v0  ;;  %v24_v3 = vld [vmem:[%s253_s1 + $0x28] sm:$0xff]  ;;  %v117_v24 = vstv %s256_s3  ;;  %vm138_vm2 = vcmask 1041409   ;;  %vm140_vm3 = vcmask 1042434   ;;  %vm143_vm4 = vcmask 59392  }
   0x2   :  { %160 = vmatpush3.msra.mxu0 %v26_v1  ;;  %v23_v4 = vld [vmem:[%s253_s1 + $0x20] sm:$0xff]  ;;  %v22_v5 = vld [vmem:[%s253_s1 + $0x18] sm:$0xff]  ;;  %v21_v6 = vld [vmem:[%s253_s1 + $0x10] sm:$0xff]  ;;  %v125_v22 = vand.u32 127, %v124_v21  ;;  %v127_v23 = vshrl.u32 %v124_v21, 7 }
   0x3   :  { %161 = vmatprep.subr.mxu0 %v180_v0  ;;  %v20_v7 = vld [vmem:[%s253_s1 + $0x8] sm:$0xff]  ;;  %v19_v8 = vld [vmem:[%s253_s1] sm:$0xff]  ;;  %v103_v10 = vld [vmem:[%s255_s2 + $0x10] sm:$0xff] }
   0x4   :  { %162 = vmatpush3.msra.mxu0 %v25_v2  ;;  %v18_v9 = vld [vmem:[%s254_s0] sm:$0xff]  ;;  %v102_v13 = vld [vmem:[%s255_s2 + $0x8] sm:$0xff]  ;;  %v128_v27 = vsub.s32 %v125_v22, %v127_v23 }
   0x5   :  { %163 = vmatprep.subr.mxu0 %v180_v0  ;;  %v101_v11 = vld [vmem:[%s255_s2] sm:$0xff] }
   0x6   :  { %164 = vmatpush3.msra.mxu0 %v24_v3 }
   0x7   :  { %165 = vmatprep.subr.mxu0 %v180_v0 }
   0x8   :  { %166 = vmatpush3.msra.mxu0 %v23_v4 }
   0x9   :  { %167 = vmatprep.subr.mxu0 %v180_v0 }
   0xa   :  { %168 = vmatpush3.msra.mxu0 %v22_v5 }
   0xb   :  { %169 = vmatprep.subr.mxu0 %v180_v0 }
   0xc   :  { %170 = vmatpush3.msra.mxu0 %v21_v6 }
   0xd   :  { %171 = vmatprep.subr.mxu0 %v180_v0 }
   0xe   :  { %172 = vmatpush3.msra.mxu0 %v20_v7 }
   0xf   :  { %173 = vmatprep.subr.mxu0 %v180_v0 }
  0x10   :  { %174 = vmatpush3.msra.mxu0 %v19_v8 }
  0x11   :  { %176 = vmatmul.mubr.msk.f32.vlgmr.msra.gmra.mxu0 %vm27_vm1, %v18_v9 }
  0xd1   :  { %v97_v12 = vpop.f32.mrf.mxu0 }
  0xd2   :  { %v106_v14 = vmul.f32 %v103_v10, %v97_v12  ;;  %v104_v15 = vmul.f32 %v101_v11, %v97_v12  ;;  %v105_v19 = vmul.f32 %v102_v13, %v97_v12 }
  0xd3   :  { %v177_v16 = vpop.f32.mrf.mxu0 }
  0xd4   :  { %v113_v17 = vsel %vm27_vm1, %v106_v14, 0.0  ;;  %v107_v18 = vsel %vm27_vm1, %v104_v15, 0.0  ;;  %v110_v20 = vsel %vm27_vm1, %v105_v19, 0.0 }
  0xd5   :  { %114 = vadd.xlane.f32.xlu1 %v113_v17  ;;  %108 = vadd.xlane.f32.xlu0 %v107_v18 }
  0xd9   :  { %111 = vadd.xlane.f32.xlu0 %v110_v20 }
 0x15e   :  { %v109_v25 = vpop.xlane.xlu0 %108  ;;  %v115_v26 = vpop.xlane.xlu1 %114 }
 0x15f   :  { %v118_v28 = vadd.f32 %v117_v24, %v109_v25  ;;  %v120_v29 = vadd.f32 %v117_v24, %v115_v26 }
 0x161   :  { %v129_v32 = vrot.slane %v118_v28, %v128_v27  ;;  %v137_v34 = vrot.slane %v120_v29, %v128_v27 }
 0x162   :  { %v112_v30 = vpop.xlane.xlu0 %111 }
 0x163   :  { %v119_v31 = vadd.f32 %v117_v24, %v112_v30 }
 0x165   :  { %v133_v33 = vrot.slane %v119_v31, %v128_v27 }
 0x167   :  { %v139_v35 = vsel %vm138_vm2, %v133_v33, %v129_v32 }
 0x168   :  { %v141_v36 = vsel %vm140_vm3, %v137_v34, %v139_v35 }
 0x169   :  { %144 = vst.msk [vmem:[%s257_s4] sm:$0x7] %vm143_vm4, %v141_v36 }

</bundles_post_ra>
